<compile_context>
chip_gen: v5e
topology: v5e:2x2
jax: 0.10.0
libtpu: 0.0.40
codegen_flags: <defaults>
</compile_context>

<pallas_src>
import warnings

import jax
import jax.numpy as jnp
import numpy as np
from jax.experimental import pallas as pl
from jax.experimental.pallas import tpu as pltpu


_LANES = 1024                           # lane-dense last dim (multiple of 128)
_MAX_TILE_BYTES = 4 * 1024 * 1024       # per-buffer tile footprint per pipeline slot
_VMEM_LIMIT_BYTES = 32 * 1024 * 1024    # 2 refs x 2 slots x 4 MiB = 16 MiB + headroom


def _sublane_align(dtype) -> int:
    """Minimum sublane multiple for a packed vreg tile of this dtype."""
    itemsize = jnp.dtype(dtype).itemsize
    # 8 for 4-byte dtypes, 16 for 2-byte (bf16/f16), 32 for 1-byte (int8/fp8).
    return max(8, 32 // max(itemsize, 1))


def _tile_rows(rows: int, dtype) -> int:
    """Tile height: full extent if it fits, else the largest aligned tile."""
    sub = _sublane_align(dtype)
    itemsize = jnp.dtype(dtype).itemsize
    max_rows = max(sub, (_MAX_TILE_BYTES // (_LANES * itemsize)) // sub * sub)
    if rows <= max_rows:
        return rows                      # single full-extent block (always legal)
    return max_rows


# ---------------------------------------------------------------------------
# Tiled, lane-dense, double-buffered copy: the pipelining / tiling scaffold a
# concrete backbone subclass would reuse (replace the body with conv/matmul).
# ---------------------------------------------------------------------------
def _identity_copy_kernel(x_ref, o_ref):
    # One lane-dense VMEM tile in, same tile out.
    o_ref[...] = x_ref[...]


def _tiled_identity_2d(x2d: jax.Array) -> jax.Array:
    """Tiled, double-buffered, lane-dense identity copy of a (rows, 1024) array."""
    rows, lanes = x2d.shape
    tr = _tile_rows(rows, x2d.dtype)
    grid = (pl.cdiv(rows, tr),)          # boundary block (if any) is clipped/masked
    bytes_accessed = 2 * x2d.size * x2d.dtype.itemsize  # read + write, mem-bound

    return pl.pallas_call(
        _identity_copy_kernel,
        out_shape=jax.ShapeDtypeStruct(x2d.shape, x2d.dtype),
        grid_spec=pltpu.PrefetchScalarGridSpec(
            num_scalar_prefetch=0,
            grid=grid,
            in_specs=[pl.BlockSpec((tr, lanes), lambda i: (i, 0))],
            out_specs=pl.BlockSpec((tr, lanes), lambda i: (i, 0)),
        ),
        compiler_params=pltpu.CompilerParams(
            # TODO(synk): on v7x, pltpu.CORE_PARALLEL on a leading size-2 grid
            # axis would split the row range across the two TensorCores;
            # "parallel" is kept here as the portable default.
            dimension_semantics=("parallel",),
            vmem_limit_bytes=_VMEM_LIMIT_BYTES,
        ),
        # Identity path: write back into the same HBM buffer (no second alloc).
        input_output_aliases={0: 0},
        cost_estimate=pl.CostEstimate(
            flops=0, transcendentals=0, bytes_accessed=bytes_accessed),
    )(x2d)


# ---------------------------------------------------------------------------
# Ragged fallback: one HBM->HBM DMA.  No grid, no VMEM staging, no pad/slice.
# ---------------------------------------------------------------------------
def _hbm_copy_kernel(x_ref, o_ref, sem):
    cp = pltpu.make_async_copy(x_ref, o_ref, sem)
    cp.start()
    cp.wait()


def _hbm_identity_1d(flat: jax.Array) -> jax.Array:
    return pl.pallas_call(
        _hbm_copy_kernel,
        out_shape=jax.ShapeDtypeStruct(flat.shape, flat.dtype),
        in_specs=[pl.BlockSpec(memory_space=pl.ANY)],
        out_specs=pl.BlockSpec(memory_space=pl.ANY),
        scratch_shapes=[pltpu.SemaphoreType.DMA(())],
    )(flat)


def _forward(x: jax.Array) -> jax.Array:
    """Identity forward of the abstract BaseBackbone (all shape math static)."""
    flat = x.reshape(-1)
    n = flat.shape[0]
    if n % _LANES == 0:
        # Aligned fast path: lane-dense 2-D view, no padding / slicing.
        rows = n // _LANES
        out = _tiled_identity_2d(flat.reshape(rows, _LANES))
    else:
        # Ragged path: single HBM->HBM DMA of the flat buffer.
        out = _hbm_identity_1d(flat)
    return out.reshape(x.shape)


_forward_jit = jax.jit(_forward)
_forward_jit_donated = jax.jit(_forward, donate_argnums=(0,))


def base_backbone_forward(x: jax.Array, y=None, *, donate: bool = False) -> jax.Array:
    """Pallas 'forward' of BaseBackbone: identity on the input feature map."""
    del y  # unused by the abstract base class
    return _forward_jit_donated(x) if donate else _forward_jit(x)


def base_backbone_forward_infer(x: jax.Array, *, donate: bool = False) -> jax.Array:
    """Inference path: identical semantics (no autograd machinery here)."""
    return base_backbone_forward(x, donate=donate)


if __name__ == "__main__":
    key = jax.random.PRNGKey(0)
    k0, k1, k2 = jax.random.split(key, 3)

    # 1) Small NCHW input — aligned fast path (2*4*16*16 = 2048 = 2 x 1024 lanes).
    x = jax.random.normal(k0, (2, 4, 16, 16), dtype=jnp.float32)
    out = jax.block_until_ready(base_backbone_forward(x))
    assert out.shape == x.shape and out.dtype == x.dtype
    assert bool(jnp.array_equal(out, x))

    # 2) Inference path, bf16 — exercises dtype-aware tiling on the fast path.
    xb = x.astype(jnp.bfloat16)
    outb = jax.block_until_ready(base_backbone_forward_infer(xb))
    assert outb.dtype == jnp.bfloat16 and bool(jnp.array_equal(outb, xb))

    # 3) Ragged size (not a multiple of 1024): HBM->HBM DMA path, no padding.
    xr = jax.random.normal(k1, (2, 3, 5, 7), dtype=jnp.float32)
    outr = jax.block_until_ready(base_backbone_forward(xr))
    assert outr.shape == xr.shape and bool(jnp.array_equal(outr, xr))

    # 4) Multi-tile grid with a clipped boundary block (1536 rows, tile 1024).
    xg = jax.random.normal(k2, (6, 4, 256, 256), dtype=jnp.float32)
    outg = jax.block_until_ready(base_backbone_forward(xg))
    assert bool(jnp.array_equal(outg, xg))

    # 5) Donated (truly in-place) aligned path; keep a host copy for the check.
    xd = jax.random.normal(k0, (2, 4, 16, 16), dtype=jnp.float32)
    xd_host = np.asarray(xd)
    with warnings.catch_warnings():
        # Donation is best-effort; suppress the non-fatal "donated buffers were
        # not usable" warning if XLA cannot alias through the reshape bitcasts.
        warnings.simplefilter("ignore")
        outd = jax.block_until_ready(base_backbone_forward(xd, donate=True))
    assert np.array_equal(np.asarray(outd), xd_host)

    print("KERNEL_OK")
</pallas_src>

<mosaic_0001>
module attributes {stable_mosaic.version = 11 : i64} {
  func.func @_identity_copy_kernel(%arg0: i32, %arg1: memref<2x1024xf32, #tpu.memory_space<vmem>>, %arg2: memref<2x1024xf32, #tpu.memory_space<vmem>>) attributes {dimension_semantics = [#tpu.dimension_semantics<parallel>], iteration_bounds = array<i64: 1>, scalar_prefetch = 0 : i64, scratch_operands = 0 : i64, tpu.core_type = #tpu.core_type<tc>, window_params = [{transform_indices = @transform_0, window_bounds = array<i64: 2, 1024>}, {transform_indices = @transform_1, window_bounds = array<i64: 2, 1024>}]} {
    %c0 = arith.constant 0 : index
    %c0_0 = arith.constant 0 : index
    %0 = vector.load %arg1[%c0, %c0_0] : memref<2x1024xf32, #tpu.memory_space<vmem>>, vector<2x1024xf32>
    %c0_1 = arith.constant 0 : index
    %c0_2 = arith.constant 0 : index
    %1 = vector.load %arg2[%c0_1, %c0_2] : memref<2x1024xf32, #tpu.memory_space<vmem>>, vector<2x1024xf32>
    tpu.vector_store %arg2[%c0_1, %c0_2], %0 {strides = array<i32>} : memref<2x1024xf32, #tpu.memory_space<vmem>>, vector<2x1024xf32>,
    return
  }
  func.func @transform_0(%arg0: i32) -> (i32, i32) {
    %c0_i32 = arith.constant 0 : i32
    %c0_i32_0 = arith.constant 0 : i32
    return %arg0, %c0_i32 : i32, i32
  }
  func.func @transform_1(%arg0: i32) -> (i32, i32) {
    %c0_i32 = arith.constant 0 : i32
    %c0_i32_0 = arith.constant 0 : i32
    return %arg0, %c0_i32 : i32, i32
  }
}

</mosaic_0001>

<bundles_post_ra>
// kernel: _forward.1
= control target key start
LH: loop header
LB: loop body
LE: loop exit
PB: predicated region body
PF: predicated region fallthrough
CT: control target
= control target key end

     0   :  { %s38_s0 = inlined_call_operand.vmem [shape: f32[2,1024], index: 0, kind: input, shape index: {}, may-alias: {0,1}]   ;;  %s39_s1 = inlined_call_operand.vmem [shape: f32[2,1024], index: 1, kind: output, shape index: {}, may-alias: {0,1}]  }
   0x1   :  { %v8_v0 = vld [vmem:[%s38_s0] sm:$0xff]  ;;  %v9_v1 = vld [vmem:[%s38_s0 + $0x8] sm:$0xff] }
   0x2   :  { %10 = vst [vmem:[%s39_s1] sm:$0xff] %v8_v0 }
   0x3   :  { %11 = vst [vmem:[%s39_s1 + $0x8] sm:$0xff] %v9_v1 }

</bundles_post_ra>
